<compile_context>
chip_gen: v7x
topology: tpu7x:2x2x1
jax: 0.10.0
libtpu: 0.0.40
codegen_flags: <defaults>
</compile_context>

<pallas_src>
import functools

import jax
import jax.numpy as jnp
from jax.experimental import pallas as pl
from jax.experimental.pallas import tpu as pltpu


# ---------------------------------------------------------------------------
# Kernel
# ---------------------------------------------------------------------------
def mtf_kernel(f0_ref, f1_ref, w_ref, o_ref, *, fuse_contraction):
    """MTF 'iade' (k=1) on one (tile_n, C, tile_hw) block.

    f0_ref / f1_ref / o_ref : (tile_n, C, tile_hw) VMEM tiles (NCHW, spatial flat)
    w_ref                   : (C, 2C) resident fused weight  [Wc | Wr+We]
    out[n] = relu( Wc @ (f0+f1) + (Wr+We) @ |f0-f1| )
    """
    c = w_ref.shape[0]
    tile_n = f0_ref.shape[0]
    for n in range(tile_n):                      # static unroll; tile_n is small
        f0 = f0_ref[n]
        f1 = f1_ref[n]
        s = f0 + f1                              # 'info' path input
        e = jnp.abs(f0 - f1)                     # relu(f0-f1)+relu(f1-f0) == |f0-f1|
        if fuse_contraction:
            # Large C: one MXU contraction of depth 2C (better K-fill).
            x = jnp.concatenate([s, e], axis=0)  # (2C, tile_hw)
            y = jnp.dot(w_ref[...], x, preferred_element_type=jnp.float32)
        else:
            y = jnp.dot(w_ref[:, :c], s, preferred_element_type=jnp.float32)
            y = y + jnp.dot(w_ref[:, c:], e, preferred_element_type=jnp.float32)
        # mode 'iade': f = relu(info + disappear + appear + exchange)
        o_ref[n] = jnp.maximum(y, 0.0).astype(o_ref.dtype)


# ---------------------------------------------------------------------------
# Generation-aware VMEM sizing
# ---------------------------------------------------------------------------
def _vmem_config():
    """Return (tile_budget_bytes, scoped_vmem_ceiling_bytes) per TensorCore."""
    phys = None
    try:
        phys = int(getattr(pltpu.get_tpu_info(), "vmem_capacity_bytes"))
    except Exception:
        phys = None
    if phys is None:
        kind = ""
        try:
            kind = jax.devices()[0].device_kind.lower()
        except Exception:
            pass
        phys = (64 << 20) if "v7" in kind else (128 << 20)
    if phys <= (64 << 20):
        # v7x: 64 MiB physical per TC; both TCs take grid shards -> stay modest.
        return 24 << 20, 48 << 20
    # v5e / v6e: 128 MiB physical VMEM.
    return 40 << 20, 96 << 20


def _choose_tiling(N, C, HW, itemsize, stream_budget, max_fold_n=8):
    """Pick (tile_n, tile_hw): lane-dense blocks bounded by the VMEM budget."""
    # 3 streams (f0, f1, out), each double-buffered.
    per_stream = max(stream_budget // 6, 128 * 128 * itemsize)

    def cols_for(rows):
        cap = per_stream // max(rows * itemsize, 1)
        if cap >= HW or HW <= 128:
            return HW                               # full extent is always legal
        return max((cap // 128) * 128, 128)         # lane-dense multiple of 128

    # Prefer folding the whole batch into each block (N x larger DMAs per grid
    # step) as long as the spatial tile stays reasonably wide.
    if N <= max_fold_n:
        cols = cols_for(N * C)
        if cols >= min(HW, 512):
            return N, cols
    return 1, cols_for(C)


# ---------------------------------------------------------------------------
# Wrapper
# ---------------------------------------------------------------------------
def mtf_forward(f0_nchw, f1_nchw, w_conv, w_res, w_exchange):
    """MTF forward (mode='iade', kernel_size=1).

    f0_nchw, f1_nchw              : (N, C, H, W)
    w_conv, w_res, w_exchange     : Conv2d 1x1 weights (C, C, 1, 1), no bias
    Returns                       : (N, C, H, W)
    """
    N, C, H, W = f0_nchw.shape
    HW = H * W
    dtype = f0_nchw.dtype
    itemsize = jnp.dtype(dtype).itemsize

    tile_budget, vmem_ceiling = _vmem_config()

    # Fused weight [Wc | Wr+We] of shape (C, 2C); 1x1 conv == left-multiply.
    wc = w_conv.reshape(C, C)
    wre = (w_res + w_exchange).reshape(C, C)
    w_cat = jnp.concatenate([wc, wre], axis=1)
    # Guard resident-weight VMEM for very large C (esp. v7x's 64 MiB/TC).
    if 4 * C * C * jnp.dtype(w_cat.dtype).itemsize > tile_budget // 2:
        w_cat = w_cat.astype(jnp.bfloat16)
        # TODO(synk): for extreme C also tile C_out on a grid axis instead of
        # keeping the full weight resident.
    w_itemsize = jnp.dtype(w_cat.dtype).itemsize
    w_db_bytes = 2 * (2 * C * C) * w_itemsize       # double-buffered resident weight

    stream_budget = max(tile_budget - w_db_bytes, 3 << 20)
    tile_n, tile_hw = _choose_tiling(N, C, HW, itemsize, stream_budget)

    # NCHW with spatial flattened -> (N, C, HW): no transposes, no padding.
    f0 = f0_nchw.reshape(N, C, HW)
    f1 = f1_nchw.reshape(N, C, HW)

    # Ragged final spatial block handled by Pallas masking (columns independent).
    grid = (pl.cdiv(N, tile_n), pl.cdiv(HW, tile_hw))

    block_bytes = tile_n * C * tile_hw * itemsize
    vmem_limit = int(min(max(6 * block_bytes + 2 * w_db_bytes + (2 << 20), 16 << 20),
                         vmem_ceiling))

    fuse_contraction = C >= 128     # single depth-2C dot only worth it for big C
    kernel = functools.partial(mtf_kernel, fuse_contraction=fuse_contraction)

    data_spec = pl.BlockSpec((tile_n, C, tile_hw), lambda n, j: (n, 0, j))

    out = pl.pallas_call(
        kernel,
        out_shape=jax.ShapeDtypeStruct((N, C, HW), dtype),
        grid_spec=pltpu.PrefetchScalarGridSpec(
            num_scalar_prefetch=0,
            grid=grid,
            in_specs=[
                data_spec,                                       # f0
                data_spec,                                       # f1
                pl.BlockSpec((C, 2 * C), lambda n, j: (0, 0)),   # [Wc | Wr+We]
            ],
            out_specs=pl.BlockSpec((tile_n, C, tile_hw), lambda n, j: (n, 0, j)),
        ),
        compiler_params=pltpu.CompilerParams(
            dimension_semantics=("parallel", "parallel"),
            vmem_limit_bytes=vmem_limit,
        ),
    )(f0, f1, w_cat)

    return out.reshape(N, C, H, W)


# ---------------------------------------------------------------------------
# Pure-JAX reference of the PyTorch forward (mode='iade', k=1)
# ---------------------------------------------------------------------------
def mtf_reference(f0, f1, w_conv, w_res, w_exchange):
    def conv1x1(x, w):  # x: NCHW, w: (Cout, Cin, 1, 1)
        return jnp.einsum('nchw,oc->nohw', x, w.reshape(w.shape[0], w.shape[1]))

    relu = lambda x: jnp.maximum(x, 0.0)
    info = conv1x1(f0 + f1, w_conv)
    disappear = conv1x1(relu(f0 - f1), w_res)
    appear = conv1x1(relu(f1 - f0), w_res)
    exchange = conv1x1(jnp.maximum(f0, f1) - jnp.minimum(f0, f1), w_exchange)
    return relu(info + disappear + appear + exchange)


if __name__ == "__main__":
    key = jax.random.PRNGKey(0)

    def make_case(key, N, C, H, W):
        k0, k1, kw0, kw1, kw2 = jax.random.split(key, 5)
        scale = 1.0 / jnp.sqrt(jnp.float32(C))
        f0 = jax.random.normal(k0, (N, C, H, W), dtype=jnp.float32)
        f1 = jax.random.normal(k1, (N, C, H, W), dtype=jnp.float32)
        w_conv = jax.random.normal(kw0, (C, C, 1, 1), dtype=jnp.float32) * scale
        w_res = jax.random.normal(kw1, (C, C, 1, 1), dtype=jnp.float32) * scale
        w_exchange = jax.random.normal(kw2, (C, C, 1, 1), dtype=jnp.float32) * scale
        return f0, f1, w_conv, w_res, w_exchange

    # Primary case: batch folded into the block (grid = (1, 1)).
    k_a, k_b = jax.random.split(key)
    f0, f1, w_conv, w_res, w_exchange = make_case(k_a, 2, 4, 16, 16)
    out = jax.block_until_ready(mtf_forward(f0, f1, w_conv, w_res, w_exchange))
    ref = mtf_reference(f0, f1, w_conv, w_res, w_exchange)
    assert out.shape == (2, 4, 16, 16)
    assert jnp.allclose(out, ref, atol=1e-5, rtol=1e-5), "mismatch vs reference (folded batch)"

    # Secondary case: batch too large to fold -> per-sample blocks (grid = (9, 1)).
    f0, f1, w_conv, w_res, w_exchange = make_case(k_b, 9, 4, 8, 8)
    out = jax.block_until_ready(mtf_forward(f0, f1, w_conv, w_res, w_exchange))
    ref = mtf_reference(f0, f1, w_conv, w_res, w_exchange)
    assert out.shape == (9, 4, 8, 8)
    assert jnp.allclose(out, ref, atol=1e-5, rtol=1e-5), "mismatch vs reference (per-sample)"

    print("KERNEL_OK")
</pallas_src>

<mosaic_0001>
module attributes {stable_mosaic.version = 11 : i64} {
  func.func @mtf_kernel(%arg0: i32, %arg1: i32, %arg2: memref<2x4x256xf32, #tpu.memory_space<vmem>>, %arg3: memref<2x4x256xf32, #tpu.memory_space<vmem>>, %arg4: memref<4x8xf32, #tpu.memory_space<vmem>>, %arg5: memref<2x4x256xf32, #tpu.memory_space<vmem>>) attributes {dimension_semantics = [#tpu.dimension_semantics<parallel>, #tpu.dimension_semantics<parallel>], iteration_bounds = array<i64: 1, 1>, scalar_prefetch = 0 : i64, scratch_operands = 0 : i64, tpu.core_type = #tpu.core_type<tc>, window_params = [{transform_indices = @transform_0, window_bounds = array<i64: 2, 4, 256>}, {transform_indices = @transform_1, window_bounds = array<i64: 2, 4, 256>}, {pipeline_mode = #tpu.pipeline_mode<synchronous>, transform_indices = @transform_2, window_bounds = array<i64: 4, 8>}, {transform_indices = @transform_3, window_bounds = array<i64: 2, 4, 256>}]} {
    %c0 = arith.constant 0 : index
    %c0_0 = arith.constant 0 : index
    %c0_1 = arith.constant 0 : index
    %0 = vector.load %arg2[%c0, %c0_0, %c0_1] : memref<2x4x256xf32, #tpu.memory_space<vmem>>, vector<1x4x256xf32>
    %1 = vector.shape_cast %0 : vector<1x4x256xf32> to vector<4x256xf32>
    %c0_2 = arith.constant 0 : index
    %c0_3 = arith.constant 0 : index
    %c0_4 = arith.constant 0 : index
    %2 = vector.load %arg3[%c0_2, %c0_3, %c0_4] : memref<2x4x256xf32, #tpu.memory_space<vmem>>, vector<1x4x256xf32>
    %3 = vector.shape_cast %2 : vector<1x4x256xf32> to vector<4x256xf32>
    %4 = arith.addf %1, %3 : vector<4x256xf32>
    %5 = arith.subf %1, %3 : vector<4x256xf32>
    %6 = math.absf %5 : vector<4x256xf32>
    %c0_5 = arith.constant 0 : index
    %c0_6 = arith.constant 0 : index
    %7 = vector.load %arg4[%c0_5, %c0_6] : memref<4x8xf32, #tpu.memory_space<vmem>>, vector<4x4xf32>
    %cst = arith.constant dense<0.000000e+00> : vector<4x256xf32>
    %8 = tpu.matmul %7, %4, %cst {dimension_numbers = #tpu.dot_dimension_numbers<[1], [0], [0], [1], [0, 0, 1, 1], [], []>} : vector<4x4xf32>, vector<4x256xf32>, vector<4x256xf32> -> vector<4x256xf32>
    %c0_7 = arith.constant 0 : index
    %c4 = arith.constant 4 : index
    %9 = vector.load %arg4[%c0_7, %c4] : memref<4x8xf32, #tpu.memory_space<vmem>>, vector<4x4xf32>
    %cst_8 = arith.constant dense<0.000000e+00> : vector<4x256xf32>
    %10 = tpu.matmul %9, %6, %cst_8 {dimension_numbers = #tpu.dot_dimension_numbers<[1], [0], [0], [1], [0, 0, 1, 1], [], []>} : vector<4x4xf32>, vector<4x256xf32>, vector<4x256xf32> -> vector<4x256xf32>
    %11 = arith.addf %8, %10 : vector<4x256xf32>
    %cst_9 = arith.constant 0.000000e+00 : f32
    %12 = vector.broadcast %cst_9 : f32 to vector<4x256xf32>
    %13 = arith.maximumf %11, %12 : vector<4x256xf32>
    %c0_10 = arith.constant 0 : index
    %c0_11 = arith.constant 0 : index
    %c0_12 = arith.constant 0 : index
    %14 = vector.load %arg5[%c0_10, %c0_11, %c0_12] : memref<2x4x256xf32, #tpu.memory_space<vmem>>, vector<1x4x256xf32>
    %15 = vector.shape_cast %14 : vector<1x4x256xf32> to vector<4x256xf32>
    %16 = vector.shape_cast %13 : vector<4x256xf32> to vector<1x4x256xf32>
    tpu.vector_store %arg5[%c0_10, %c0_11, %c0_12], %16 {strides = array<i32>} : memref<2x4x256xf32, #tpu.memory_space<vmem>>, vector<1x4x256xf32>,
    %c1 = arith.constant 1 : index
    %c0_13 = arith.constant 0 : index
    %c0_14 = arith.constant 0 : index
    %17 = vector.load %arg2[%c1, %c0_13, %c0_14] : memref<2x4x256xf32, #tpu.memory_space<vmem>>, vector<1x4x256xf32>
    %18 = vector.shape_cast %17 : vector<1x4x256xf32> to vector<4x256xf32>
    %c1_15 = arith.constant 1 : index
    %c0_16 = arith.constant 0 : index
    %c0_17 = arith.constant 0 : index
    %19 = vector.load %arg3[%c1_15, %c0_16, %c0_17] : memref<2x4x256xf32, #tpu.memory_space<vmem>>, vector<1x4x256xf32>
    %20 = vector.shape_cast %19 : vector<1x4x256xf32> to vector<4x256xf32>
    %21 = arith.addf %18, %20 : vector<4x256xf32>
    %22 = arith.subf %18, %20 : vector<4x256xf32>
    %23 = math.absf %22 : vector<4x256xf32>
    %c0_18 = arith.constant 0 : index
    %c0_19 = arith.constant 0 : index
    %24 = vector.load %arg4[%c0_18, %c0_19] : memref<4x8xf32, #tpu.memory_space<vmem>>, vector<4x4xf32>
    %cst_20 = arith.constant dense<0.000000e+00> : vector<4x256xf32>
    %25 = tpu.matmul %24, %21, %cst_20 {dimension_numbers = #tpu.dot_dimension_numbers<[1], [0], [0], [1], [0, 0, 1, 1], [], []>} : vector<4x4xf32>, vector<4x256xf32>, vector<4x256xf32> -> vector<4x256xf32>
    %c0_21 = arith.constant 0 : index
    %c4_22 = arith.constant 4 : index
    %26 = vector.load %arg4[%c0_21, %c4_22] : memref<4x8xf32, #tpu.memory_space<vmem>>, vector<4x4xf32>
    %cst_23 = arith.constant dense<0.000000e+00> : vector<4x256xf32>
    %27 = tpu.matmul %26, %23, %cst_23 {dimension_numbers = #tpu.dot_dimension_numbers<[1], [0], [0], [1], [0, 0, 1, 1], [], []>} : vector<4x4xf32>, vector<4x256xf32>, vector<4x256xf32> -> vector<4x256xf32>
    %28 = arith.addf %25, %27 : vector<4x256xf32>
    %cst_24 = arith.constant 0.000000e+00 : f32
    %29 = vector.broadcast %cst_24 : f32 to vector<4x256xf32>
    %30 = arith.maximumf %28, %29 : vector<4x256xf32>
    %c1_25 = arith.constant 1 : index
    %c0_26 = arith.constant 0 : index
    %c0_27 = arith.constant 0 : index
    %31 = vector.load %arg5[%c1_25, %c0_26, %c0_27] : memref<2x4x256xf32, #tpu.memory_space<vmem>>, vector<1x4x256xf32>
    %32 = vector.shape_cast %31 : vector<1x4x256xf32> to vector<4x256xf32>
    %33 = vector.shape_cast %30 : vector<4x256xf32> to vector<1x4x256xf32>
    tpu.vector_store %arg5[%c1_25, %c0_26, %c0_27], %33 {strides = array<i32>} : memref<2x4x256xf32, #tpu.memory_space<vmem>>, vector<1x4x256xf32>,
    return
  }
  func.func @transform_0(%arg0: i32, %arg1: i32) -> (i32, i32, i32) {
    %c0_i32 = arith.constant 0 : i32
    %c0_i32_0 = arith.constant 0 : i32
    return %arg0, %c0_i32, %arg1 : i32, i32, i32
  }
  func.func @transform_1(%arg0: i32, %arg1: i32) -> (i32, i32, i32) {
    %c0_i32 = arith.constant 0 : i32
    %c0_i32_0 = arith.constant 0 : i32
    return %arg0, %c0_i32, %arg1 : i32, i32, i32
  }
  func.func @transform_2(%arg0: i32, %arg1: i32) -> (i32, i32) {
    %c0_i32 = arith.constant 0 : i32
    %c0_i32_0 = arith.constant 0 : i32
    %c0_i32_1 = arith.constant 0 : i32
    return %c0_i32, %c0_i32_0 : i32, i32
  }
  func.func @transform_3(%arg0: i32, %arg1: i32) -> (i32, i32, i32) {
    %c0_i32 = arith.constant 0 : i32
    %c0_i32_0 = arith.constant 0 : i32
    return %arg0, %c0_i32, %arg1 : i32, i32, i32
  }
}

</mosaic_0001>

<bundles_post_ra>
// kernel: tpu_custom_call.1
= control target key start
LH: loop header
LB: loop body
LE: loop exit
PB: predicated region body
PF: predicated region fallthrough
CT: control target
= control target key end

     0   :  { %8 = vsyncpa [#allocation3], 0  ;;  %s595_s0 = inlined_call_operand.hbm [shape: f32[2,4,256], index: 0, kind: input, shape index: {}]   ;;  %s596_s1 = inlined_call_operand.hbm [shape: f32[2,4,256], index: 1, kind: input, shape index: {}]   ;;  %s597_s2 = inlined_call_operand.vmem [shape: f32[4,8], index: 2, kind: input, shape index: {}]   ;;  %s598_s3 = inlined_call_operand.hbm [shape: f32[2,4,256], index: 3, kind: output, shape index: {}]  }
   0x1   :  { %9 = vsyncpa [#allocation6], 0 }
   0x2   :  { %10 = vsyncpa [#allocation4], 0  ;;  %s509_s12 = smov [#allocation2]   ;;  %s437_s16 = scalar_lea.hbm %s595_s0, 256 }
   0x3   :  { %s16_s13 = sshll.u32 %s509_s12, 4  ;;  %p438_p0 = scmp.ne.s32.totalorder %s595_s0, %s437_s16  ;;  %s17_s13 = int_to_ptr.vmem [resolvable:$true] %s16_s13 }
   0x4   :  { %p441_p1 = scmp.lt.u32.totalorder %s437_s16, %s595_s0 }
   0x6   :  { %p443_p2 = pnand %p441_p1, %p438_p0 }
   0x8   :  { %446 = shalt.err (!%p443_p2)
}
   0x9   :  { %s447_s21 = scalar_lea.vmem %s17_s13, 256  ;;  %p452_p4 = scmp.lt.s32.totalorder %s17_s13, %s17_s13 }
   0xa   :  { %p448_p3 = scmp.ne.s32.totalorder %s17_s13, %s447_s21  ;;  %p453_p5 = scmp.lt.s32.totalorder %s447_s21, %s447_s21 }
   0xc   :  { %p454_p6 = por %p453_p5, %p452_p4 }
   0xe   :  { %p455_p7 = pnand %p454_p6, %p448_p3 }
  0x10   :  { %458 = shalt.err (!%p455_p7)
}
  0x11   :  { %s510_s22 = smov 128   ;;  %s511_s23 = smov 8  }
  0x12   :  { %22 = dma.hbm_to_vmem [thread:$0]  %s595_s0, 256, %s17_s13, [#allocation3], %s510_s22, %s510_s22, %s511_s23  }
  0x13   :  { %s512_s26 = smov [#allocation5]   ;;  %s459_s30 = scalar_lea.hbm %s596_s1, 256 }
  0x14   :  { %s28_s27 = sshll.u32 %s512_s26, 4  ;;  %p460_p8 = scmp.ne.s32.totalorder %s596_s1, %s459_s30  ;;  %s29_s27 = int_to_ptr.vmem [resolvable:$true] %s28_s27 }
  0x15   :  { %p463_p9 = scmp.lt.u32.totalorder %s459_s30, %s596_s1 }
  0x17   :  { %p465_p10 = pnand %p463_p9, %p460_p8 }
  0x19   :  { %468 = shalt.err (!%p465_p10)
}
  0x1a   :  { %s469_s8 = scalar_lea.vmem %s29_s27, 256  ;;  %p474_p12 = scmp.lt.s32.totalorder %s29_s27, %s29_s27 }
  0x1b   :  { %p470_p11 = scmp.ne.s32.totalorder %s29_s27, %s469_s8  ;;  %p475_p13 = scmp.lt.s32.totalorder %s469_s8, %s469_s8 }
  0x1d   :  { %p476_p0 = por %p475_p13, %p474_p12 }
  0x1f   :  { %p477_p1 = pnand %p476_p0, %p470_p11 }
  0x21   :  { %480 = shalt.err (!%p477_p1)
}
  0x22   :  { %34 = dma.hbm_to_vmem [thread:$0]  %s596_s1, 256, %s29_s27, [#allocation6], %s510_s22, %s510_s22, %s511_s23  }
  0x23   :  { %503 = dma.done.wait [#allocation3], 256  }
  0x24   :  { %504 = vsyncadd [#allocation3], 4294967040 }
  0x25   :  { %505 = dma.done.wait [#allocation6], 256  }
  0x26   :  { %506 = vsyncadd [#allocation6], 4294967040  ;;  %v513_v0 = vmov 0.0   ;;  %v48_v1 = vld [vmem:[%s597_s2] sm:$0xf]  ;;  %s514_s12 = smov 124  }
  0x27   :  { %126 = vmatprep.mubr.f32.mxu0 %v513_v0  ;;  %302 = vmatprep.mubr.f32.mxu1 %v513_v0  ;;  %v43_v2 = vld [vmem:[#allocation2] sm:$0xff]  ;;  %v44_v3 = vld [vmem:[#allocation5] sm:$0xff]  ;;  %v220_v4 = vld [vmem:[#allocation2 + $0x8] sm:$0xff]  ;;  %vm57_vm0 = vcmask 1043456   ;;  %vm54_vm1 = vcmask 31744   ;;  %s515_s1 = smov [#allocation7]  }
  0x28   :  { %50 = vrot.lane.b32.xlu0 %v48_v1, %s514_s12  ;;  %v222_v5 = vld [vmem:[#allocation5 + $0x8] sm:$0xff]  ;;  %v226_v6 = vld [vmem:[%s597_s2] sm:$0xf]  ;;  %v45_v7 = vadd.f32 %v44_v3, %v43_v2  ;;  %v46_v8 = vsub.f32 %v43_v2, %v44_v3  ;;  %s401_s2 = sshll.u32 %s515_s1, 4  ;;  %s402_s2 = int_to_ptr.vmem [resolvable:$true] %s401_s2 }
  0x29   :  { %v223_v9 = vadd.f32 %v222_v5, %v220_v4  ;;  %v224_v10 = vsub.f32 %v220_v4, %v222_v5  ;;  %s481_s15 = scalar_lea.vmem %s402_s2, 256  ;;  %p486_p3 = scmp.lt.s32.totalorder %s402_s2, %s402_s2 }
  0x2a   :  { %v47_v11 = vand.u32 2147483647, %v46_v8  ;;  %v134_v16 = vcombine.high %v45_v7, %v45_v7  ;;  %p482_p2 = scmp.ne.s32.totalorder %s402_s2, %s481_s15  ;;  %p487_p4 = scmp.lt.s32.totalorder %s481_s15, %s481_s15 }
  0x2b   :  { %v225_v12 = vand.u32 2147483647, %v224_v10  ;;  %v310_v15 = vcombine.high %v223_v9, %v223_v9 }
  0x2c   :  { %228 = vrot.lane.b32.xlu0 %v226_v6, %s514_s12  ;;  %v53_v13 = vcombine.high %v47_v11, %v47_v11  ;;  %p488_p5 = por %p487_p4, %p486_p3 }
  0x2d   :  { %v231_v14 = vcombine.high %v225_v12, %v225_v12 }
  0x2e   :  { %414 = vmatprep.subr.msk.mxu0 %vm57_vm0, %v53_v13  ;;  %p489_p6 = pnand %p488_p5, %p482_p2 }
  0x2f   :  { %420 = vmatprep.subr.msk.mxu1 %vm57_vm0, %v231_v14  ;;  %415 = vmatpush1.msk.msra.mxu0 %vm57_vm0, %v47_v11 }
  0x30   :  { %421 = vmatpush1.msk.msra.mxu1 %vm57_vm0, %v225_v12  ;;  %417 = vmatprep.subr.msk.mxu0 %vm57_vm0, %v134_v16 }
  0x31   :  { %423 = vmatprep.subr.msk.mxu1 %vm57_vm0, %v310_v15 }
  0x9a   :  { %v51_v17 = vpop.permute.xlu0 %50 }
  0x9b   :  { %416 = vmatmul.mubr.msk.f32.vlgmr.msra.gmra.mrb[0].mxu0 %vm54_vm1, %v51_v17 }
  0x9c   :  { %418 = vmatpush1.msk.msra.mxu0 %vm57_vm0, %v45_v7  ;;  %205 = vmatprep.mubr.f32.mxu0 %v513_v0 }
  0x9e   :  { %v229_v18 = vpop.permute.xlu0 %228 }
  0x9f   :  { %422 = vmatmul.mubr.msk.f32.vlgmr.msra.gmra.mrb[0].mxu1 %vm54_vm1, %v229_v18 }
  0xa0   :  { %424 = vmatpush1.msk.msra.mxu1 %vm57_vm0, %v223_v9  ;;  %381 = vmatprep.mubr.f32.mxu1 %v513_v0 }
  0xa3   :  { %419 = vmatmul.mubr.msk.f32.vlgmr.msra.gmra.mrb[0].mxu0 %vm54_vm1, %v48_v1 }
  0xa7   :  { %425 = vmatmul.mubr.msk.f32.vlgmr.msra.gmra.mrb[0].mxu1 %vm54_vm1, %v226_v6 }
 0x176   :  { %v207_v19 = vpop.f32.mrb[0].mxu0 }
 0x177   :  { %v212_v20 = vmax.f32 %v207_v19, 0.0  ;;  %v209_v21 = vpop.f32.mrb[1].mxu0 }
 0x178   :  { %v213_v22 = vmax.f32 %v209_v21, 0.0 }
 0x17a   :  { %v216_v23 = vcombine.low %v212_v20, %v213_v22  ;;  %v383_v24 = vpop.f32.mrb[0].mxu1 }
 0x17b   :  { %v388_v25 = vmax.f32 %v383_v24, 0.0  ;;  %v385_v26 = vpop.f32.mrb[1].mxu1 }
 0x17c   :  { %218 = vst [vmem:[#allocation7] sm:$0xff] %v216_v23  ;;  %v389_v27 = vmax.f32 %v385_v26, 0.0 }
 0x17e   :  { %v392_v28 = vcombine.low %v388_v25, %v389_v27 }
 0x180   :  { %395 = vst [vmem:[#allocation7 + $0x8] sm:$0xff] %v392_v28 }
 0x181   :  { %492 = shalt.err (!%p489_p6)
}
 0x182   :  { %s493_s18 = scalar_lea.hbm %s598_s3, 256 }
 0x183   :  { %p494_p7 = scmp.ne.s32.totalorder %s598_s3, %s493_s18  ;;  %p497_p8 = scmp.lt.u32.totalorder %s493_s18, %s598_s3 }
 0x185   :  { %p499_p9 = pnand %p497_p8, %p494_p7 }
 0x187   :  { %502 = shalt.err (!%p499_p9)
}
 0x188   :  { %407 = dma.vmem_to_hbm [thread:$0]  %s402_s2, 256, %s598_s3, [#allocation4], %s510_s22, %s510_s22, %s511_s23  }
 0x189   :  { %507 = dma.done.wait [#allocation4], 256  }
 0x18a   :  { %508 = vsyncadd [#allocation4], 4294967040 }
 0x18b   :  { %411 = vsyncpa [#allocation3], 1 }
 0x18c   :  { %412 = vsyncpa [#allocation6], 1 }
 0x18d   :  { %413 = vsyncpa [#allocation4], 1 }

</bundles_post_ra>
